<compile_context>
chip_gen: v6e
topology: v6e:2x2x1
jax: 0.10.0
libtpu: 0.0.40
codegen_flags: <defaults>
</compile_context>

<pallas_src>
import math

import jax
import jax.numpy as jnp
from jax.experimental import pallas as pl
from jax.experimental.pallas import tpu as pltpu


def _sublane_pack(itemsize):
    # Rows in one packed sublane group: 8 for f32, 16 for bf16, 32 for int8/fp8.
    return 8 * max(1, 4 // itemsize)


def _largest_divisor_leq(n, cap):
    cap = max(1, min(n, cap))
    for d in range(cap, 0, -1):
        if n % d == 0:
            return d
    return 1


def _hw_params():
    """(block byte target, vmem_limit_bytes, two_tensorcore_hint) per generation."""
    try:
        vmem_cap = int(pltpu.get_tpu_info().vmem_capacity_bytes)
    except Exception:
        vmem_cap = 64 * 1024 * 1024  # conservative fallback (v7x-like / unknown)
    if vmem_cap >= 100 * 1024 * 1024:        # v5e / v6e: 128 MiB VMEM, 1 TC
        return 8 * 1024 * 1024, 64 * 1024 * 1024, False
    else:                                    # v7x: 64 MiB / TC, 2 TCs (or unknown)
        return 4 * 1024 * 1024, 32 * 1024 * 1024, True


def _choose_tiles(B, n, M, itemsize, target_bytes, split_for_two_cores):
    """Pick (tb, tm, nk) for blocks x:(tb, nk, tm) -> out:(tb, tm).

    Output tile stays (8,128)-legal: tb == B or tb % pack == 0; tm % 128 == 0
    or tm == M.  nk divides n exactly (no ragged reduction blocks)."""
    pack = _sublane_pack(itemsize)

    # Batch tile: full B when small, else one packed sublane group (maybe widened).
    tb = B if B <= pack else pack

    # Lane tile: keep HBM rows as long as possible (ideally the whole feature
    # row); only shrink if a block with >= min(n, pack) repeat rows would blow
    # the byte target.
    # Note: for M < 128 (and small n) output stores are lane-masked; folding
    # 128//M batch rows per output row would make them dense, not done here.
    nk_min = min(n, pack)
    tm_cap = max(128, target_bytes // max(1, tb * nk_min * itemsize))
    if M <= 128 or tm_cap >= M:
        tm = M
    else:
        tm = max(128, (tm_cap // 128) * 128)

    # Repeat-axis tile: largest exact divisor of n fitting the byte budget.
    nk_cap = max(1, target_bytes // max(1, tb * tm * itemsize))
    nk = n if nk_cap >= n else _largest_divisor_leq(n, nk_cap)

    # If one block already covers (n, M), widen the batch tile toward the byte
    # target so each block is one long contiguous HBM chunk.
    if nk == n and tm == M and B > pack:
        tb_budget = (target_bytes // max(1, n * M * itemsize)) // pack * pack
        tb = max(pack, min(max(pack, tb_budget), (B // pack) * pack))

    # v7x: make sure both TensorCores get work along a "parallel" axis.
    if split_for_two_cores and pl.cdiv(B, tb) * pl.cdiv(M, tm) == 1:
        if tm >= 256:
            tm = max(128, (tm // 2 // 128) * 128)
        elif tb >= 2 * pack:
            tb = max(pack, (tb // 2 // pack) * pack)
        # else: block too small for the split to matter.

    return tb, tm, nk


def _make_repeat_decoder_kernel(n, nk, chunk):
    inv_n = 1.0 / n  # Python float literal -> jaxpr constant, not a captured array.

    def kernel(x_ref, o_ref, acc_ref):
        # x_ref: (tb, nk, tm), o_ref: (tb, tm), acc_ref: (tb, tm) f32 scratch.
        k = pl.program_id(2)

        @pl.when(k == 0)
        def _():
            acc_ref[...] = jnp.zeros_like(acc_ref)

        # Sum this block's slice of the repeat axis in f32, in packing-aligned
        # static chunks, then a single accumulator read-modify-write.
        partial = jnp.zeros(acc_ref.shape, jnp.float32)
        for c0 in range(0, nk, chunk):
            c1 = min(c0 + chunk, nk)
            partial = partial + jnp.sum(
                x_ref[:, c0:c1, :].astype(jnp.float32), axis=1)
        acc_ref[...] += partial

        @pl.when(k == pl.num_programs(2) - 1)
        def _():
            o_ref[...] = (acc_ref[...] * inv_n).astype(o_ref.dtype)

    return kernel


def repeat_decoder(x, n):
    """Pallas implementation of RepeatDecoder(n).forward(x)."""
    B = x.shape[0]
    total = math.prod(x.shape[1:])
    assert total % n == 0, f"cannot view {x.shape} as (B, {n}, -1)"
    M = total // n
    itemsize = jnp.dtype(x.dtype).itemsize

    # Glue: torch .view() -> plain JAX reshape outside the kernel.
    xr = x.reshape(B, n, M)

    target_bytes, vmem_limit, two_cores = _hw_params()
    tb, tm, nk = _choose_tiles(B, n, M, itemsize, target_bytes, two_cores)
    grid = (pl.cdiv(B, tb), pl.cdiv(M, tm), n // nk)

    chunk = min(nk, _sublane_pack(itemsize))
    kernel = _make_repeat_decoder_kernel(n, nk, chunk)

    cost = pl.CostEstimate(
        flops=B * n * M,
        transcendentals=0,
        bytes_accessed=(B * n * M + B * M) * itemsize,
    )

    return pl.pallas_call(
        kernel,
        out_shape=jax.ShapeDtypeStruct((B, M), x.dtype),
        grid_spec=pltpu.PrefetchScalarGridSpec(
            num_scalar_prefetch=0,
            grid=grid,
            in_specs=[pl.BlockSpec((tb, nk, tm), lambda i, j, k: (i, k, j))],
            out_specs=pl.BlockSpec((tb, tm), lambda i, j, k: (i, j)),
            scratch_shapes=[pltpu.VMEM((tb, tm), jnp.float32)],
        ),
        compiler_params=pltpu.CompilerParams(
            dimension_semantics=("parallel", "parallel", "arbitrary"),
            vmem_limit_bytes=vmem_limit,
        ),
        cost_estimate=cost,
    )(xr)


if __name__ == "__main__":
    # Small example consistent with the module: x of shape (B, C, H, W) viewed
    # as (B, n, -1) and averaged over the n repeats.
    B, C, H, W = 2, 4, 16, 16
    n = 4  # RepeatDecoder(n=4)

    key = jax.random.PRNGKey(0)
    x = jax.random.normal(key, (B, C, H, W), dtype=jnp.float32)

    out = jax.block_until_ready(repeat_decoder(x, n))

    # Reference check (pure JAX mirror of the torch forward).
    ref = x.reshape(B, n, -1).mean(axis=1)
    assert out.shape == ref.shape == (B, (C * H * W) // n)
    assert jnp.allclose(out, ref, atol=1e-5, rtol=1e-5)

    print("KERNEL_OK")
</pallas_src>

<mosaic_0001>
module attributes {stable_mosaic.version = 11 : i64} {
  func.func @kernel(%arg0: i32, %arg1: i32, %arg2: i32, %arg3: memref<2x4x128xf32, #tpu.memory_space<vmem>>, %arg4: memref<2x128xf32, #tpu.memory_space<vmem>>, %arg5: memref<2x128xf32, #tpu.memory_space<vmem>>) attributes {dimension_semantics = [#tpu.dimension_semantics<parallel>, #tpu.dimension_semantics<parallel>, #tpu.dimension_semantics<arbitrary>], iteration_bounds = array<i64: 1, 2, 1>, scalar_prefetch = 0 : i64, scratch_operands = 1 : i64, tpu.core_type = #tpu.core_type<tc>, window_params = [{transform_indices = @transform_0, window_bounds = array<i64: 2, 4, 128>}, {transform_indices = @transform_1, window_bounds = array<i64: 2, 128>}]} {
    %c0_i32 = arith.constant 0 : i32
    %0 = arith.cmpi eq, %arg2, %c0_i32 : i32
    %1 = arith.extui %0 : i1 to i32
    %c0_i32_0 = arith.constant 0 : i32
    %2 = arith.cmpi ne, %1, %c0_i32_0 : i32
    scf.if %2 {
      %cst_10 = arith.constant 0.000000e+00 : f32
      %13 = vector.broadcast %cst_10 : f32 to vector<2x128xf32>
      %c0_11 = arith.constant 0 : index
      %c0_12 = arith.constant 0 : index
      %14 = vector.load %arg5[%c0_11, %c0_12] : memref<2x128xf32, #tpu.memory_space<vmem>>, vector<2x128xf32>
      tpu.vector_store %arg5[%c0_11, %c0_12], %13 {strides = array<i32>} : memref<2x128xf32, #tpu.memory_space<vmem>>, vector<2x128xf32>,
    } else {
    }
    %cst = arith.constant 0.000000e+00 : f32
    %3 = vector.broadcast %cst : f32 to vector<2x128xf32>
    %c0 = arith.constant 0 : index
    %c0_1 = arith.constant 0 : index
    %c0_2 = arith.constant 0 : index
    %4 = vector.load %arg3[%c0, %c0_1, %c0_2] : memref<2x4x128xf32, #tpu.memory_space<vmem>>, vector<2x4x128xf32>
    %cst_3 = arith.constant dense<0.000000e+00> : vector<2x128xf32>
    %5 = vector.multi_reduction <add>, %4, %cst_3 [1] : vector<2x4x128xf32> to vector<2x128xf32>
    %6 = arith.addf %3, %5 : vector<2x128xf32>
    %c0_4 = arith.constant 0 : index
    %c0_5 = arith.constant 0 : index
    %7 = vector.load %arg5[%c0_4, %c0_5] : memref<2x128xf32, #tpu.memory_space<vmem>>, vector<2x128xf32>
    %8 = arith.addf %7, %6 : vector<2x128xf32>
    %c0_6 = arith.constant 0 : index
    %c0_7 = arith.constant 0 : index
    %9 = vector.load %arg5[%c0_6, %c0_7] : memref<2x128xf32, #tpu.memory_space<vmem>>, vector<2x128xf32>
    tpu.vector_store %arg5[%c0_6, %c0_7], %8 {strides = array<i32>} : memref<2x128xf32, #tpu.memory_space<vmem>>, vector<2x128xf32>,
    %c0_i32_8 = arith.constant 0 : i32
    %10 = arith.cmpi eq, %arg2, %c0_i32_8 : i32
    %11 = arith.extui %10 : i1 to i32
    %c0_i32_9 = arith.constant 0 : i32
    %12 = arith.cmpi ne, %11, %c0_i32_9 : i32
    scf.if %12 {
      %c0_10 = arith.constant 0 : index
      %c0_11 = arith.constant 0 : index
      %13 = vector.load %arg5[%c0_10, %c0_11] : memref<2x128xf32, #tpu.memory_space<vmem>>, vector<2x128xf32>
      %cst_12 = arith.constant 2.500000e-01 : f32
      %14 = vector.broadcast %cst_12 : f32 to vector<2x128xf32>
      %15 = arith.mulf %13, %14 : vector<2x128xf32>
      %c0_13 = arith.constant 0 : index
      %c0_14 = arith.constant 0 : index
      %16 = vector.load %arg4[%c0_13, %c0_14] : memref<2x128xf32, #tpu.memory_space<vmem>>, vector<2x128xf32>
      tpu.vector_store %arg4[%c0_13, %c0_14], %15 {strides = array<i32>} : memref<2x128xf32, #tpu.memory_space<vmem>>, vector<2x128xf32>,
    } else {
    }
    return
  }
  func.func @transform_0(%arg0: i32, %arg1: i32, %arg2: i32) -> (i32, i32, i32) {
    %c0_i32 = arith.constant 0 : i32
    return %arg0, %arg2, %arg1 : i32, i32, i32
  }
  func.func @transform_1(%arg0: i32, %arg1: i32, %arg2: i32) -> (i32, i32) {
    %c0_i32 = arith.constant 0 : i32
    return %arg0, %arg1 : i32, i32
  }
}

</mosaic_0001>

<bundles_post_ra>
// kernel: tpu_custom_call.1
= control target key start
LH: loop header
LB: loop body
LE: loop exit
PB: predicated region body
PF: predicated region fallthrough
CT: control target
= control target key end

     0   :  { %6 = vsyncpa [#allocation4], 0  ;;  %s642_s0 = inlined_call_operand.hbm [shape: f32[2,4,256], index: 0, kind: input, shape index: {}]   ;;  %s643_s1 = inlined_call_operand.hbm [shape: f32[2,256], index: 1, kind: output, shape index: {}]  }
   0x1   :  { %8 = vsyncpa [#allocation4 + $0x1], 0 }
   0x2   :  { %9 = vsyncpa [#allocation5], 0 }
   0x3   :  { %11 = vsyncpa [#allocation5 + $0x1], 0  ;;  %s511_s6 = smov 0   ;;  %s513_s7 = smov 0  }
   0x4   :  { %s515_s8 = smov 0   ;;  %s517_s9 = smov 0  }
   0x5   :  { %s519_s10 = smov 0   ;;  %s521_s11 = smov 0  }
   0x6 LB: > { %s306_s12 = sadd.s32 4294967295, %s493_s11   ;;  %s307_s13 = sadd.s32 4294967294, %s493_s11   ;;  %s493_s11 = sphi %s521_s11, %s17_s11   ;;  %s489_s10 = sphi %s519_s10, %s654_s10   ;;  %s485_s9 = sphi %s517_s9, %s653_s9   ;;  %s481_s8 = sphi %s515_s8, %s652_s8   ;;  %s477_s7 = sphi %s513_s7, %s651_s7   ;;  %s473_s6 = sphi %s511_s6, %s650_s6  }
   0x7   : > { %s32_s14 = sadd.s32 1, %s489_s10  ;;  %s47_s15 = sadd.s32 1, %s481_s8 }
   0x8   : > { %p34_p0 = scmp.ge.s32.totalorder %s32_s14, 2  ;;  %p54_p1 = scmp.ne.s32.totalorder %s481_s8, %s477_s7 }
   0x9   : > { %p55_p2 = scmp.eq.s32.totalorder %s493_s11, 0  ;;  %p60_p3 = scmp.ne.s32.totalorder %s477_s7, %s473_s6 }
   0xa   : > { %s656_s14 = smov (%p34_p0, %s32_s14), 0  ;;  %p61_p5 = scmp.eq.s32.totalorder %s306_s12, 0 }
   0xb   : > { %p552_p4 = por %p55_p2, %p54_p1  ;;  %s43_s17 = ssub.s32 %s489_s10, %s656_s14 }
   0xc   : > { %p86_p6 = scmp.eq.s32.totalorder %s306_s12, 1  ;;  %p45_p7 = scmp.eq.s32.totalorder %s43_s17, 0 }
   0xd   : > { %p558_p8 = por %p61_p5, %p60_p3  ;;  %p92_p10 = scmp.eq.s32.totalorder %s307_s13, 1 }
   0xe   : > { %p562_p9 = por %p86_p6, %p54_p1  ;;  %p331_p13 = scmp.lt.s32.totalorder %s493_s11, 2 }
   0xf   : > { %s567_s20 = scalar_select %p45_p7, %s481_s8, %s47_s15  }
  0x10   : > { %p569_p11 = por %p92_p10, %p60_p3  ;;  %s112_s22 = sand.u32 1, %s481_s8  }
  0x11   : > { %s310_s23 = sshll.u32 %s112_s22, 3  ;;  %s311_s24 = sshll.u32 %s489_s10, 6 }
  0x12   : > { %s126_s27 = scalar_lea.hbm %s642_s0, %s311_s24  ;;  %s116_s28 = scalar_lea.vmem [#allocation3], %s310_s23 }
  0x13   : > { %s127_s29 = sshll.u32 %s116_s28, 4  ;;  %p582_p0 = pnand %p331_p13, %p552_p4  ;;  %s128_s29 = int_to_ptr.vmem [resolvable:$true] %s127_s29 }
  0x14   : > { %s113_s2 = scalar_lea.sflag [#allocation4], %s112_s22  ;;  %s398_s3 = scalar_lea.vmem %s128_s29, 128 }
  0x15   : > { %p387_p1 = pneg %p582_p0  ;;  %p399_p2 = scmp.ne.s32.totalorder %s128_s29, %s398_s3 }
  0x16   : > { %s495_s4 = smov [#allocation3]  }
  0x17   : > { %p401_p3 = pnand %p399_p2, %p387_p1  ;;  %s403_s5 = sshll.u32 %s495_s4, 4  ;;  %s404_s5 = int_to_ptr.vmem [resolvable:$false] %s403_s5 }
  0x18   : > { %s405_s12 = scalar_lea.vmem %s404_s5, 256  ;;  %p406_p6 = scmp.lt.s32.totalorder %s128_s29, %s404_s5 }
  0x19   : > { %p402_p5 = pneg %p401_p3  ;;  %p407_p7 = scmp.lt.s32.totalorder %s405_s12, %s398_s3 }
  0x1b   : > { %p408_p10 = por %p407_p7, %p406_p6 }
  0x1d   : > { %p409_p12 = pnand %p408_p10, %p402_p5 }
  0x1f   : > { %412 = shalt.err (!%p409_p12)
}
  0x20   : > { %s496_s13 = smov 128   ;;  %s497_s15 = smov 64  }
  0x21   : > { %s498_s16 = smov 4   ;;  %p312_p4 = scmp.ge.s32.totalorder %s493_s11, 1 }
  0x22   : > { %326 = dma.hbm_to_vmem [thread:$0]  (!%p582_p0), %s126_s27, 128, %s128_s29, %s113_s2, %s496_s13, %s497_s15, %s498_s16  }
  0x23   : > { %p135_p13 = scmp.lt.s32.totalorder %s493_s11, 3 }
  0x25   : > { %p136_p1 = pnand %p312_p4, %p135_p13 }
  0x26   : > { %s593_s17 = sand.u32 (!%p136_p1), 1, %s477_s7  }
  0x27   : > { %139 = sbr.rel (%p136_p1) target bundleno = 86 (0x56), region = 24  ;;  %s313_s22 = sshll.u32 (!%p136_p1), %s593_s17, 3 }
  0x28   : > { %s142_s23 = scalar_lea.sflag (!%p136_p1), [#allocation4], %s593_s17  ;;  %s145_s24 = scalar_lea.vmem (!%p136_p1), [#allocation3], %s313_s22 }
  0x2c   : > { %464 = dma.done.wait (%p558_p8), %s142_s23, 128  }
  0x2d   : > { %466 = vsyncadd (%p558_p8), %s142_s23, 4294967168  ;;  %v499_v0 = vmov 0.0   ;;  %vm172_vm0 = vcmask 1043456   ;;  %v170_v1 = vld [vmem:[%s145_s24] sm:$0xf]  ;;  %vm192_vm1 = vcmask 1041409  }
  0x2e   : > { %169 = vst [vmem:[#allocation2] sm:$0x3] %v499_v0  ;;  %v171_v2 = vld [vmem:[%s145_s24 + $0x4] sm:$0xf]  ;;  %v173_v3 = vsel %vm172_vm0, %v170_v1, 0.0  ;;  %s314_s18 = sshll.u32 %s593_s17, 1 }
  0x2f   : > { %v180_v4 = vsel %vm172_vm0, %v171_v2, 0.0  ;;  %v174_v5 = vrot.slane %v173_v3, 4  ;;  %s163_s25 = scalar_lea.vmem [#allocation6], %s314_s18  ;;  %s316_s27 = sshll.u32 %s485_s9, 5 }
  0x30   : > { %v181_v6 = vrot.slane %v180_v4, 4  ;;  %s219_s26 = sshll.u32 %s163_s25, 4  ;;  %s217_s30 = scalar_lea.hbm %s643_s1, %s316_s27  ;;  %s220_s26 = int_to_ptr.vmem [resolvable:$true] %s219_s26 }
  0x31   : > { %v175_v7 = vadd.f32 %v174_v5, %v173_v3  ;;  %s204_s2 = scalar_lea.sflag [#allocation5], %s593_s17  ;;  %s413_s3 = scalar_lea.vmem %s220_s26, 32 }
  0x32   : > { %v182_v8 = vadd.f32 %v181_v6, %v180_v4  ;;  %p414_p8 = scmp.ne.s32.totalorder %s220_s26, %s413_s3  ;;  %s500_s4 = smov [#allocation6]  }
  0x33   : > { %v176_v9 = vrot.slane %v175_v7, 2  ;;  %s417_s5 = sshll.u32 %s500_s4, 4  ;;  %s418_s5 = int_to_ptr.vmem [resolvable:$false] %s417_s5 }
  0x34   : > { %v183_v10 = vrot.slane %v182_v8, 2  ;;  %p415_p12 = pnand %p414_p8, %p562_p9  ;;  %s419_s12 = scalar_lea.vmem %s418_s5, 64 }
  0x35   : > { %v177_v11 = vadd.f32 %v176_v9, %v175_v7  ;;  %v189_v17 = vld [vmem:[#allocation2] sm:$0x3]  ;;  %p420_p2 = scmp.lt.s32.totalorder %s220_s26, %s418_s5  ;;  %p421_p3 = scmp.lt.s32.totalorder %s419_s12, %s413_s3 }
  0x36   : > { %v184_v12 = vadd.f32 %v183_v10, %v182_v8  ;;  %p416_p0 = pneg %p415_p12 }
  0x37   : > { %v178_v13 = vrot.slane %v177_v11, 1  ;;  %p422_p5 = por %p421_p3, %p420_p2 }
  0x38   : > { %v185_v14 = vrot.slane %v184_v12, 1 }
  0x39   : > { %v179_v15 = vadd.f32 %v178_v13, %v177_v11  ;;  %p423_p6 = pnand %p422_p5, %p416_p0 }
  0x3a   : > { %v186_v16 = vadd.f32 %v185_v14, %v184_v12 }
  0x3c   : > { %v193_v18 = vsel %vm192_vm1, %v186_v16, %v179_v15 }
  0x3d   : > { %v195_v19 = vadd.f32 %v193_v18, %v189_v17 }
  0x3f   : > { %196 = vst [vmem:[#allocation2] sm:$0x3] %v195_v19 }
  0x46   : > { %v200_v20 = vld [vmem:[#allocation2] sm:$0x3] }
  0x47   : > { %v201_v21 = vmul.f32 0.25, %v200_v20 }
  0x49   : > { %202 = vst [vmem:[%s163_s25] sm:$0x3] %v201_v21 }
  0x4a   : > { %426 = shalt.err (!%p423_p6)
}
  0x4b   : > { %s427_s9 = scalar_lea.hbm %s217_s30, 32  ;;  %s431_s16 = scalar_lea.hbm %s643_s1, 64 }
  0x4c   : > { %p428_p7 = scmp.ne.s32.totalorder %s217_s30, %s427_s9  ;;  %p432_p13 = scmp.lt.s32.totalorder %s217_s30, %s643_s1 }
  0x4d   : > { %p433_p1 = scmp.lt.s32.totalorder %s431_s16, %s427_s9 }
  0x4e   : > { %p429_p10 = pnand %p428_p7, %p562_p9 }
  0x4f   : > { %p434_p8 = por %p433_p1, %p432_p13 }
  0x50   : > { %p430_p4 = pneg %p429_p10 }
  0x52   : > { %p435_p12 = pnand %p434_p8, %p430_p4 }
  0x54   : > { %438 = shalt.err (!%p435_p12)
}
  0x55   : > { %321 = dma.vmem_to_hbm [thread:$0]  (%p562_p9), %s220_s26, 32, %s217_s30, %s204_s2  }
  0x56 PF: > { %s231_s23 = sand.u32 1, %s473_s6   ;;  %p649_p0 = scmp.ge.s32.totalorder %s493_s11, 2 }
  0x57   : > { %s232_s24 = scalar_lea.sflag [#allocation5], %s231_s23 }
  0x58   : > { %p328_p2 = pnand %p649_p0, %p569_p11 }
  0x5a   : > { %p329_p3 = pneg %p328_p2 }
  0x5c   : > { %468 = dma.done.wait (%p329_p3), %s232_s24, 32  }
  0x5d   : > { %470 = vsyncadd (%p329_p3), %s232_s24, 4294967264  ;;  %s17_s11 = sadd.s32 1, %s493_s11   ;;  %s650_s6 = smov %s477_s7 }
  0x5e   : > { %p14_p5 = scmp.ge.s32.totalorder %s17_s11, 4   ;;  %s651_s7 = smov %s481_s8 }
  0x5f   : > { %s652_s8 = smov %s567_s20  ;;  %s653_s9 = smov %s489_s10 }
  0x60   : > { %s654_s10 = smov %s656_s14  ;;  %16 = sbr.rel (!%p14_p5) target bundleno = 6 (0x6), region = 77 }
  0x65   :  { %237 = vsyncpa [#allocation4], 1 }
  0x66   :  { %239 = vsyncpa [#allocation4 + $0x1], 1 }
  0x67   :  { %240 = vsyncpa [#allocation5], 1 }
  0x68   :  { %242 = vsyncpa [#allocation5 + $0x1], 1 }

</bundles_post_ra>
